<compile_context>
chip_gen: v5e
topology: v5e:2x2
jax: 0.10.0
libtpu: 0.0.40
codegen_flags: <defaults>
</compile_context>

<pallas_src>
import functools

import jax
import jax.numpy as jnp
from jax.experimental import pallas as pl
from jax.experimental.pallas import tpu as pltpu


def _round_up(a, b):
    return (a + b - 1) // b * b


def _fused_mlp_kernel(x_ref, *refs, nlayers):
    """All MLP layers fused; inter-layer activations stay on-chip (bf16).

    x_ref:            (tm, d_in_pad_0)          bf16 zero-padded activations
    refs[:L]:         (d_in_pad_l, d_out_pad_l) bf16 zero-padded W^T per layer
    refs[L:2L]:       (1, d_out_pad_l)          f32 zero-padded bias per layer
    refs[2L]:         (tm, d_out_pad_{L-1})     f32 output tile
    """
    w_refs = refs[:nlayers]
    b_refs = refs[nlayers:2 * nlayers]
    o_ref = refs[2 * nlayers]

    h = x_ref[...]  # bf16
    for l in range(nlayers):  # static, fully unrolled
        # MXU matmul in bf16 with f32 accumulation.
        y = jnp.dot(h, w_refs[l][...], preferred_element_type=jnp.float32)
        # f32 epilogue on the VPU (bias broadcast + ReLU).
        y = y + b_refs[l][...]
        if l != nlayers - 1:
            # Carry the activation in bf16: halves vreg/VMEM pressure and
            # removes a per-layer f32->bf16 cast feeding the next matmul.
            h = jnp.maximum(y, 0.0).astype(jnp.bfloat16)
        else:
            h = y  # final layer: keep f32 for the output store
    o_ref[...] = h.astype(o_ref.dtype)


def init_mlp_params(key, ninput, nh, noutput, nlayers):
    """Deterministic init mirroring the nn.Linear shapes in MLP.__init__.

    Each layer stores (W_t: (in, out), b: (out,)), i.e. PyTorch weight transposed.
    """
    dims = []
    if nlayers == 1:
        dims.append((ninput, noutput))
    else:
        dims.append((ninput, nh))
        for _ in range(nlayers - 2):
            dims.append((nh, nh))
        dims.append((nh, noutput))

    params = []
    for (fan_in, fan_out) in dims:
        key, kw, kb = jax.random.split(key, 3)
        bound = 1.0 / jnp.sqrt(jnp.float32(fan_in))
        # PyTorch Linear default: U(-1/sqrt(fan_in), 1/sqrt(fan_in)) for W and b.
        w = jax.random.uniform(kw, (fan_in, fan_out), jnp.float32, -bound, bound)
        b = jax.random.uniform(kb, (fan_out,), jnp.float32, -bound, bound)
        params.append((w, b))
    return params


def pack_mlp_params(params):
    """Pad each layer to its own 128-multiples and cast weights to bf16.

    Runs ONCE at init (eagerly, outside the jitted forward) so the padded/cast
    slabs are reused across every forward call. Zero padding is
    semantics-preserving: padded input columns are zero, padded weight rows
    contribute nothing, padded weight columns / bias entries are zero, so the
    padded output columns stay zero through ReLU and every subsequent layer.
    Consecutive layers share padded dims because d_out[l] == d_in[l+1].
    """
    ws, bs = [], []
    for (w, b) in params:
        d_in, d_out = w.shape
        d_in_p = _round_up(d_in, 128)
        d_out_p = _round_up(d_out, 128)
        wp = jnp.zeros((d_in_p, d_out_p), jnp.bfloat16)
        wp = wp.at[:d_in, :d_out].set(w.astype(jnp.bfloat16))
        bp = jnp.zeros((1, d_out_p), jnp.float32)
        bp = bp.at[0, :d_out].set(b.astype(jnp.float32))
        ws.append(wp)
        bs.append(bp)
    return tuple(ws), tuple(bs)


@functools.partial(jax.jit, static_argnames=("ninput", "noutput"))
def mlp_forward(x, w_packed, b_packed, *, ninput, noutput):
    """Reproduces MLP.forward with one fused Pallas kernel.

    forward: h = x.view(-1, ninput); Linear+ReLU x (L-1); Linear.
    `w_packed` / `b_packed` come from `pack_mlp_params` (pre-padded, bf16).
    """
    L = len(w_packed)
    d_in_pad = w_packed[0].shape[0]
    d_out_pad = w_packed[-1].shape[1]

    h = x.reshape(-1, ninput)
    M = h.shape[0]

    # --- batch tiling ------------------------------------------------------
    # 16-sublane alignment (native bf16 packing). Tile cap 512 rows (better
    # HBM-roofline fraction than 256, fewer grid-step overheads). If a single
    # tile would cover the whole batch, split it in two so the "parallel" grid
    # axis can shard across both TensorCores on v7x megacore parts.
    m_pad = _round_up(max(M, 1), 16)
    if m_pad <= 512:
        tm = m_pad if m_pad < 32 else _round_up(-(-m_pad // 2), 16)
    else:
        tm = 512
    m_pad = _round_up(m_pad, tm)

    # bf16 activation input: matmuls run in bf16 anyway; halves x DMA bytes.
    x_pad = jnp.zeros((m_pad, d_in_pad), jnp.bfloat16)
    x_pad = x_pad.at[:M, :ninput].set(h.astype(jnp.bfloat16))

    # --- VMEM budget --------------------------------------------------------
    # Weights/biases are single-buffered (Buffered(1), constant index_map);
    # x/out tiles are double-buffered by the pipeline; plus headroom for the
    # in-kernel f32/bf16 activation working set.
    w_bytes = sum(int(w.size) * 2 for w in w_packed)
    b_bytes = sum(int(b.size) * 4 for b in b_packed)
    io_bytes = 2 * tm * (d_in_pad * 2 + d_out_pad * 4)
    act_bytes = 8 * tm * max(int(w.shape[1]) for w in w_packed)
    needed = w_bytes + b_bytes + io_bytes + act_bytes
    vmem_limit = int(min(100 * 2**20, max(32 * 2**20, int(needed * 1.5) + (1 << 20))))
    # TODO(synk): when w_bytes exceeds ~50% of per-TC VMEM (v7x: 64 MiB/TC),
    # switch to a weight-streaming path (weights in HBM via memory_space=pl.ANY
    # + pltpu.emit_pipeline per layer/K-chunk) instead of the resident slab.

    kernel = functools.partial(_fused_mlp_kernel, nlayers=L)

    in_specs = [pl.BlockSpec((tm, d_in_pad), lambda i: (i, 0))]
    for wp in w_packed:
        # Constant index_map + single buffering: fetched once, VMEM-resident
        # across all batch tiles, no wasted double-buffer copy.
        in_specs.append(
            pl.BlockSpec(wp.shape, lambda i: (0, 0), pipeline_mode=pl.Buffered(1)))
    for bp in b_packed:
        in_specs.append(
            pl.BlockSpec(bp.shape, lambda i: (0, 0), pipeline_mode=pl.Buffered(1)))

    out_pad = pl.pallas_call(
        kernel,
        out_shape=jax.ShapeDtypeStruct((m_pad, d_out_pad), jnp.float32),
        grid=(m_pad // tm,),
        in_specs=in_specs,
        out_specs=pl.BlockSpec((tm, d_out_pad), lambda i: (i, 0)),
        compiler_params=pltpu.CompilerParams(
            dimension_semantics=("parallel",),  # batch tiles are independent
            vmem_limit_bytes=vmem_limit,
        ),
    )(x_pad, *w_packed, *b_packed)

    return out_pad[:M, :noutput]


def mlp_reference_bf16(x, params, ninput):
    """Plain-JAX reference matching the kernel's precision policy
    (bf16 matmul inputs, f32 accumulation, bf16 inter-layer carry)."""
    h = x.reshape(-1, ninput).astype(jnp.bfloat16)
    for i, (w, b) in enumerate(params):
        y = jnp.dot(h, w.astype(jnp.bfloat16),
                    preferred_element_type=jnp.float32) + b
        if i != len(params) - 1:
            h = jnp.maximum(y, 0.0).astype(jnp.bfloat16)
        else:
            h = y
    return h


def mlp_reference_f32(x, params, ninput):
    """Full-precision reference (module semantics)."""
    h = x.reshape(-1, ninput)
    for i, (w, b) in enumerate(params):
        h = h @ w + b
        if i != len(params) - 1:
            h = jnp.maximum(h, 0.0)
    return h


if __name__ == "__main__":
    ninput, nh, noutput, nlayers = 32, 64, 16, 3

    key = jax.random.PRNGKey(0)
    key, kx = jax.random.split(key)
    # Input of shape (2, 4, 8); forward views it as (-1, ninput) = (2, 32).
    x = jax.random.normal(kx, (2, 4, 8), jnp.float32)

    params = init_mlp_params(key, ninput, nh, noutput, nlayers)
    # Pack ONCE at init (outside the jitted path); reused for every forward.
    w_packed, b_packed = pack_mlp_params(params)

    out = mlp_forward(x, w_packed, b_packed, ninput=ninput, noutput=noutput)
    out = jax.block_until_ready(out)

    ref_bf16 = mlp_reference_bf16(x, params, ninput)
    ref_f32 = mlp_reference_f32(x, params, ninput)

    assert out.shape == (2, noutput), out.shape
    assert jnp.allclose(out, ref_bf16, atol=2e-2, rtol=2e-2), "mismatch vs bf16 reference"
    assert jnp.allclose(out, ref_f32, atol=5e-2, rtol=5e-2), "mismatch vs f32 reference"

    print("KERNEL_OK")
</pallas_src>

<mosaic_0001>
module attributes {stable_mosaic.version = 11 : i64} {
  func.func @_fused_mlp_kernel(%arg0: i32, %arg1: memref<16x128xbf16, #tpu.memory_space<vmem>>, %arg2: memref<128x128xbf16, #tpu.memory_space<vmem>>, %arg3: memref<128x128xbf16, #tpu.memory_space<vmem>>, %arg4: memref<128x128xbf16, #tpu.memory_space<vmem>>, %arg5: memref<1x128xf32, #tpu.memory_space<vmem>>, %arg6: memref<1x128xf32, #tpu.memory_space<vmem>>, %arg7: memref<1x128xf32, #tpu.memory_space<vmem>>, %arg8: memref<16x128xf32, #tpu.memory_space<vmem>>) attributes {dimension_semantics = [#tpu.dimension_semantics<parallel>], iteration_bounds = array<i64: 1>, scalar_prefetch = 0 : i64, scratch_operands = 0 : i64, tpu.core_type = #tpu.core_type<tc>, window_params = [{transform_indices = @transform_0, window_bounds = array<i64: 16, 128>}, {pipeline_mode = #tpu.pipeline_mode<synchronous>, transform_indices = @transform_1, window_bounds = array<i64: 128, 128>}, {pipeline_mode = #tpu.pipeline_mode<synchronous>, transform_indices = @transform_2, window_bounds = array<i64: 128, 128>}, {pipeline_mode = #tpu.pipeline_mode<synchronous>, transform_indices = @transform_3, window_bounds = array<i64: 128, 128>}, {pipeline_mode = #tpu.pipeline_mode<synchronous>, transform_indices = @transform_4, window_bounds = array<i64: 1, 128>}, {pipeline_mode = #tpu.pipeline_mode<synchronous>, transform_indices = @transform_5, window_bounds = array<i64: 1, 128>}, {pipeline_mode = #tpu.pipeline_mode<synchronous>, transform_indices = @transform_6, window_bounds = array<i64: 1, 128>}, {transform_indices = @transform_7, window_bounds = array<i64: 16, 128>}]} {
    %c0 = arith.constant 0 : index
    %c0_0 = arith.constant 0 : index
    %0 = vector.load %arg1[%c0, %c0_0] : memref<16x128xbf16, #tpu.memory_space<vmem>>, vector<16x128xbf16>
    %c0_1 = arith.constant 0 : index
    %c0_2 = arith.constant 0 : index
    %1 = vector.load %arg2[%c0_1, %c0_2] : memref<128x128xbf16, #tpu.memory_space<vmem>>, vector<128x128xbf16>
    %cst = arith.constant dense<0.000000e+00> : vector<16x128xf32>
    %2 = tpu.matmul %0, %1, %cst {dimension_numbers = #tpu.dot_dimension_numbers<[1], [0], [0], [1], [0, 0, 1, 1], [], []>} : vector<16x128xbf16>, vector<128x128xbf16>, vector<16x128xf32> -> vector<16x128xf32>
    %c0_3 = arith.constant 0 : index
    %c0_4 = arith.constant 0 : index
    %3 = vector.load %arg5[%c0_3, %c0_4] : memref<1x128xf32, #tpu.memory_space<vmem>>, vector<1x128xf32>
    %4 = vector.broadcast %3 : vector<1x128xf32> to vector<16x128xf32>
    %5 = arith.addf %2, %4 : vector<16x128xf32>
    %cst_5 = arith.constant 0.000000e+00 : f32
    %6 = vector.broadcast %cst_5 : f32 to vector<16x128xf32>
    %7 = arith.maximumf %5, %6 : vector<16x128xf32>
    %8 = arith.truncf %7 : vector<16x128xf32> to vector<16x128xbf16>
    %c0_6 = arith.constant 0 : index
    %c0_7 = arith.constant 0 : index
    %9 = vector.load %arg3[%c0_6, %c0_7] : memref<128x128xbf16, #tpu.memory_space<vmem>>, vector<128x128xbf16>
    %cst_8 = arith.constant dense<0.000000e+00> : vector<16x128xf32>
    %10 = tpu.matmul %8, %9, %cst_8 {dimension_numbers = #tpu.dot_dimension_numbers<[1], [0], [0], [1], [0, 0, 1, 1], [], []>} : vector<16x128xbf16>, vector<128x128xbf16>, vector<16x128xf32> -> vector<16x128xf32>
    %c0_9 = arith.constant 0 : index
    %c0_10 = arith.constant 0 : index
    %11 = vector.load %arg6[%c0_9, %c0_10] : memref<1x128xf32, #tpu.memory_space<vmem>>, vector<1x128xf32>
    %12 = vector.broadcast %11 : vector<1x128xf32> to vector<16x128xf32>
    %13 = arith.addf %10, %12 : vector<16x128xf32>
    %cst_11 = arith.constant 0.000000e+00 : f32
    %14 = vector.broadcast %cst_11 : f32 to vector<16x128xf32>
    %15 = arith.maximumf %13, %14 : vector<16x128xf32>
    %16 = arith.truncf %15 : vector<16x128xf32> to vector<16x128xbf16>
    %c0_12 = arith.constant 0 : index
    %c0_13 = arith.constant 0 : index
    %17 = vector.load %arg4[%c0_12, %c0_13] : memref<128x128xbf16, #tpu.memory_space<vmem>>, vector<128x128xbf16>
    %cst_14 = arith.constant dense<0.000000e+00> : vector<16x128xf32>
    %18 = tpu.matmul %16, %17, %cst_14 {dimension_numbers = #tpu.dot_dimension_numbers<[1], [0], [0], [1], [0, 0, 1, 1], [], []>} : vector<16x128xbf16>, vector<128x128xbf16>, vector<16x128xf32> -> vector<16x128xf32>
    %c0_15 = arith.constant 0 : index
    %c0_16 = arith.constant 0 : index
    %19 = vector.load %arg7[%c0_15, %c0_16] : memref<1x128xf32, #tpu.memory_space<vmem>>, vector<1x128xf32>
    %20 = vector.broadcast %19 : vector<1x128xf32> to vector<16x128xf32>
    %21 = arith.addf %18, %20 : vector<16x128xf32>
    %c0_17 = arith.constant 0 : index
    %c0_18 = arith.constant 0 : index
    %22 = vector.load %arg8[%c0_17, %c0_18] : memref<16x128xf32, #tpu.memory_space<vmem>>, vector<16x128xf32>
    tpu.vector_store %arg8[%c0_17, %c0_18], %21 {strides = array<i32>} : memref<16x128xf32, #tpu.memory_space<vmem>>, vector<16x128xf32>,
    return
  }
  func.func @transform_0(%arg0: i32) -> (i32, i32) {
    %c0_i32 = arith.constant 0 : i32
    %c0_i32_0 = arith.constant 0 : i32
    return %arg0, %c0_i32 : i32, i32
  }
  func.func @transform_1(%arg0: i32) -> (i32, i32) {
    %c0_i32 = arith.constant 0 : i32
    %c0_i32_0 = arith.constant 0 : i32
    %c0_i32_1 = arith.constant 0 : i32
    return %c0_i32, %c0_i32_0 : i32, i32
  }
  func.func @transform_2(%arg0: i32) -> (i32, i32) {
    %c0_i32 = arith.constant 0 : i32
    %c0_i32_0 = arith.constant 0 : i32
    %c0_i32_1 = arith.constant 0 : i32
    return %c0_i32, %c0_i32_0 : i32, i32
  }
  func.func @transform_3(%arg0: i32) -> (i32, i32) {
    %c0_i32 = arith.constant 0 : i32
    %c0_i32_0 = arith.constant 0 : i32
    %c0_i32_1 = arith.constant 0 : i32
    return %c0_i32, %c0_i32_0 : i32, i32
  }
  func.func @transform_4(%arg0: i32) -> (i32, i32) {
    %c0_i32 = arith.constant 0 : i32
    %c0_i32_0 = arith.constant 0 : i32
    %c0_i32_1 = arith.constant 0 : i32
    return %c0_i32, %c0_i32_0 : i32, i32
  }
  func.func @transform_5(%arg0: i32) -> (i32, i32) {
    %c0_i32 = arith.constant 0 : i32
    %c0_i32_0 = arith.constant 0 : i32
    %c0_i32_1 = arith.constant 0 : i32
    return %c0_i32, %c0_i32_0 : i32, i32
  }
  func.func @transform_6(%arg0: i32) -> (i32, i32) {
    %c0_i32 = arith.constant 0 : i32
    %c0_i32_0 = arith.constant 0 : i32
    %c0_i32_1 = arith.constant 0 : i32
    return %c0_i32, %c0_i32_0 : i32, i32
  }
  func.func @transform_7(%arg0: i32) -> (i32, i32) {
    %c0_i32 = arith.constant 0 : i32
    %c0_i32_0 = arith.constant 0 : i32
    return %arg0, %c0_i32 : i32, i32
  }
}

</mosaic_0001>

<bundles_post_ra>
// kernel: mlp_forward.1
= control target key start
LH: loop header
LB: loop body
LE: loop exit
PB: predicated region body
PF: predicated region fallthrough
CT: control target
= control target key end

     0   :  { %12 = vsyncpa [#allocation3], 0  ;;  %s622_s0 = inlined_call_operand.vmem [shape: bf16[16,128], index: 0, kind: input, shape index: {}]   ;;  %s623_s1 = inlined_call_operand.hbm [shape: bf16[128,128], index: 1, kind: input, shape index: {}]   ;;  %s624_s2 = inlined_call_operand.hbm [shape: bf16[128,128], index: 2, kind: input, shape index: {}]   ;;  %s625_s3 = inlined_call_operand.hbm [shape: bf16[128,128], index: 3, kind: input, shape index: {}]   ;;  %s626_s4 = inlined_call_operand.vmem [shape: f32[1,128], index: 4, kind: input, shape index: {}]   ;;  %s627_s5 = inlined_call_operand.vmem [shape: f32[1,128], index: 5, kind: input, shape index: {}]   ;;  %s628_s6 = inlined_call_operand.vmem [shape: f32[1,128], index: 6, kind: input, shape index: {}]   ;;  %s629_s7 = inlined_call_operand.vmem [shape: f32[16,128], index: 7, kind: output, shape index: {}]  }
   0x1   :  { %13 = vsyncpa [#allocation5], 0  ;;  %s33_s26 = sshll.u32 %s624_s2, 4  ;;  %s550_s27 = smov [#allocation4]   ;;  %s34_s26 = int_to_ptr.hbm [resolvable:$true] %s33_s26 }
   0x2   :  { %s35_s28 = sshll.u32 %s550_s27, 4  ;;  %s20_s8 = sshll.u32 %s623_s1, 4  ;;  %s36_s28 = int_to_ptr.vmem [resolvable:$true] %s35_s28  ;;  %s21_s8 = int_to_ptr.hbm [resolvable:$true] %s20_s8 }
   0x3   :  { %s551_s9 = smov 64   ;;  %s552_s10 = smov 4  }
   0x4   :  { %41 = dma.hbm_to_vmem [thread:$0]  %s34_s26, 1024, %s36_s28, [#allocation5], %s551_s9, %s551_s9, %s552_s10  }
   0x5   :  { %s553_s11 = smov [#allocation2]   ;;  %s46_s15 = sshll.u32 %s625_s3, 4  ;;  %s47_s15 = int_to_ptr.hbm [resolvable:$true] %s46_s15 }
   0x6   :  { %s22_s12 = sshll.u32 %s553_s11, 4  ;;  %s554_s2 = smov [#allocation6]   ;;  %s23_s12 = int_to_ptr.vmem [resolvable:$true] %s22_s12 }
   0x7   :  { %28 = dma.hbm_to_vmem [thread:$0]  %s21_s8, 1024, %s23_s12, [#allocation3], %s551_s9, %s551_s9, %s552_s10  }
   0x8   :  { %s48_s16 = sshll.u32 %s554_s2, 4  ;;  %s49_s16 = int_to_ptr.vmem [resolvable:$true] %s48_s16 }
   0x9   :  { %54 = dma.hbm_to_vmem [thread:$0]  %s47_s15, 1024, %s49_s16, [#allocation5], %s551_s9, %s551_s9, %s552_s10  }
   0xa   :  { %546 = dma.done.wait [#allocation3], 1024  }
   0xb   :  { %547 = vsyncadd [#allocation3], 4294966272 }
   0xc   :  { %548 = dma.done.wait [#allocation5], 2048  }
   0xd   :  { %549 = vsyncadd [#allocation5], 4294965248  ;;  %v449_v0 = vld [vmem:[#allocation2 + $0x38] sm:$0xff]  ;;  %v448_v1 = vld [vmem:[#allocation2 + $0x30] sm:$0xff] }
   0xe   :  { %149 = vmatpush.bf16.msra.mxu0 %v449_v0  ;;  %v457_v2 = vld [vmem:[#allocation4 + $0x38] sm:$0xff]  ;;  %v456_v3 = vld [vmem:[#allocation4 + $0x30] sm:$0xff]  ;;  %v447_v4 = vld [vmem:[#allocation2 + $0x28] sm:$0xff] }
   0xf   :  { %234 = vmatpush.bf16.msra.mxu1 %v457_v2  ;;  %v455_v5 = vld [vmem:[#allocation4 + $0x28] sm:$0xff]  ;;  %v446_v6 = vld [vmem:[#allocation2 + $0x20] sm:$0xff]  ;;  %v445_v8 = vld [vmem:[#allocation2 + $0x18] sm:$0xff] }
  0x10   :  { %v454_v7 = vld [vmem:[#allocation4 + $0x20] sm:$0xff]  ;;  %v444_v9 = vld [vmem:[#allocation2 + $0x10] sm:$0xff]  ;;  %v443_v10 = vld [vmem:[#allocation2 + $0x8] sm:$0xff] }
  0x11   :  { %v442_v11 = vld [vmem:[#allocation2] sm:$0xff]  ;;  %v453_v13 = vld [vmem:[#allocation4 + $0x18] sm:$0xff]  ;;  %v452_v14 = vld [vmem:[#allocation4 + $0x10] sm:$0xff] }
  0x12   :  { %150 = vmatpush.bf16.msra.mxu0 %v448_v1  ;;  %v441_v12 = vld [vmem:[%s622_s0] sm:$0xff]  ;;  %v451_v15 = vld [vmem:[#allocation4 + $0x8] sm:$0xff]  ;;  %v465_v17 = vld [vmem:[#allocation6 + $0x38] sm:$0xff] }
  0x13   :  { %235 = vmatpush.bf16.msra.mxu1 %v456_v3  ;;  %v450_v16 = vld [vmem:[#allocation4] sm:$0xff]  ;;  %319 = vmatpush.bf16.msra.mxu2 %v465_v17  ;;  %v464_v18 = vld [vmem:[#allocation6 + $0x30] sm:$0xff]  ;;  %v463_v19 = vld [vmem:[#allocation6 + $0x28] sm:$0xff] }
  0x14   :  { %v462_v20 = vld [vmem:[#allocation6 + $0x20] sm:$0xff]  ;;  %v461_v29 = vld [vmem:[#allocation6 + $0x18] sm:$0xff]  ;;  %v460_v30 = vld [vmem:[#allocation6 + $0x10] sm:$0xff] }
  0x15   :  { %v471_v22 = vld [vmem:[%s626_s4] ss:$0 sm:$0xff]  ;;  %v459_v31 = vld [vmem:[#allocation6 + $0x8] sm:$0xff] }
  0x16   :  { %151 = vmatpush.bf16.msra.mxu0 %v447_v4  ;;  %v458_v32 = vld [vmem:[#allocation6] sm:$0xff] }
  0x17   :  { %236 = vmatpush.bf16.msra.mxu1 %v455_v5  ;;  %320 = vmatpush.bf16.msra.mxu2 %v464_v18  ;;  %v472_v34 = vld [vmem:[%s627_s5] ss:$0 sm:$0xff] }
  0x18   :  { %v473_v41 = vld [vmem:[%s628_s6] ss:$0 sm:$0xff] }
  0x1a   :  { %152 = vmatpush.bf16.msra.mxu0 %v446_v6 }
  0x1b   :  { %237 = vmatpush.bf16.msra.mxu1 %v454_v7  ;;  %321 = vmatpush.bf16.msra.mxu2 %v463_v19 }
  0x1e   :  { %153 = vmatpush.bf16.msra.mxu0 %v445_v8 }
  0x1f   :  { %238 = vmatpush.bf16.msra.mxu1 %v453_v13  ;;  %322 = vmatpush.bf16.msra.mxu2 %v462_v20 }
  0x22   :  { %154 = vmatpush.bf16.msra.mxu0 %v444_v9 }
  0x23   :  { %239 = vmatpush.bf16.msra.mxu1 %v452_v14  ;;  %323 = vmatpush.bf16.msra.mxu2 %v461_v29 }
  0x26   :  { %155 = vmatpush.bf16.msra.mxu0 %v443_v10 }
  0x27   :  { %240 = vmatpush.bf16.msra.mxu1 %v451_v15  ;;  %324 = vmatpush.bf16.msra.mxu2 %v460_v30 }
  0x2a   :  { %156 = vmatpush.bf16.msra.mxu0 %v442_v11 }
  0x2b   :  { %241 = vmatpush.bf16.msra.mxu1 %v450_v16  ;;  %325 = vmatpush.bf16.msra.mxu2 %v459_v31 }
  0x2d   :  { %157 = vmatmul.bf16.vlgmr.msra.gmra.mxu0 %v441_v12 }
  0x2f   :  { %326 = vmatpush.bf16.msra.mxu2 %v458_v32 }
  0xaa   :  { %v158_v21 = vpop.f32.mrf.mxu0 }
  0xab   :  { %v159_v23 = vadd.f32 %v471_v22, %v158_v21 }
  0xad   :  { %v163_v26 = vmax.f32 %v159_v23, 0.0 }
  0xb2   :  { %v160_v24 = vpop.f32.mrf.mxu0 }
  0xb3   :  { %v161_v25 = vadd.f32 %v471_v22, %v160_v24 }
  0xb5   :  { %v164_v27 = vmax.f32 %v161_v25, 0.0 }
  0xb7   :  { %v165_v28 = vpack.c.bf16 %v164_v27, %v163_v26 }
  0xb9   :  { %242 = vmatmul.bf16.vlgmr.msra.gmra.mxu1 %v165_v28 }
 0x136   :  { %v243_v33 = vpop.f32.mrf.mxu1 }
 0x137   :  { %v244_v35 = vadd.f32 %v472_v34, %v243_v33 }
 0x139   :  { %v248_v38 = vmax.f32 %v244_v35, 0.0 }
 0x13e   :  { %v245_v36 = vpop.f32.mrf.mxu1 }
 0x13f   :  { %v246_v37 = vadd.f32 %v472_v34, %v245_v36 }
 0x141   :  { %v249_v39 = vmax.f32 %v246_v37, 0.0 }
 0x143   :  { %v250_v40 = vpack.c.bf16 %v249_v39, %v248_v38 }
 0x145   :  { %327 = vmatmul.bf16.vlgmr.msra.gmra.mxu2 %v250_v40 }
 0x1c8   :  { %v328_v42 = vpop.f32.mrf.mxu2 }
 0x1c9   :  { %v329_v43 = vadd.f32 %v473_v41, %v328_v42 }
 0x1cb   :  { %333 = vst [vmem:[%s629_s7] sm:$0xff] %v329_v43 }
 0x1d0   :  { %v330_v44 = vpop.f32.mrf.mxu2 }
 0x1d1   :  { %v331_v45 = vadd.f32 %v473_v41, %v330_v44 }
 0x1d3   :  { %334 = vst [vmem:[%s629_s7 + $0x8] sm:$0xff] %v331_v45 }
 0x1d4   :  { %339 = vsyncpa [#allocation3], 1 }
 0x1d5   :  { %340 = vsyncpa [#allocation5], 1 }

</bundles_post_ra>
